<compile_context>
chip_gen: v7x
topology: tpu7x:2x2x1
jax: 0.10.0
libtpu: 0.0.40
codegen_flags: <defaults>
</compile_context>

<pallas_src>
import functools
import math

import jax
import jax.numpy as jnp
from jax.experimental import pallas as pl
from jax.experimental.pallas import tpu as pltpu


def _round_up(x, m):
    return (x + m - 1) // m * m


def _vmem_capacity_bytes():
    try:
        return int(pltpu.get_tpu_info().vmem_capacity_bytes)
    except Exception:
        return 64 * 1024 * 1024  # conservative: v7x per-TensorCore VMEM


# ---------------------------------------------------------------------------
# Stage 1: support = features @ W   (computed once, row-tiled)
# ---------------------------------------------------------------------------
def _feature_transform_kernel(feat_ref, w_ref, sup_ref):
    # feat_ref: [t_n, F_in]   w_ref: [F_in, F_out_p]   sup_ref: [t_n, F_out_p]
    sup_ref[...] = jnp.dot(
        feat_ref[...], w_ref[...], preferred_element_type=jnp.float32
    ).astype(sup_ref.dtype)


# ---------------------------------------------------------------------------
# Stage 2: out = [relu](adj @ support)
#   - resident variant : whole support lives in VMEM, sliced per K step
#   - streaming variant: support K-slabs streamed (fallback for huge N)
# Both accumulate directly into the f32 out_ref (resident across k).
# ---------------------------------------------------------------------------
def _adj_matmul_resident_kernel(adj_ref, sup_ref, out_ref, *, active, t_k):
    # adj_ref: [t_n, t_k]  sup_ref: [n_p, F_out_p]  out_ref: [t_n, F_out_p] f32
    k = pl.program_id(1)

    @pl.when(k == 0)
    def _init():
        out_ref[...] = jnp.zeros_like(out_ref)

    k_off = pl.multiple_of(k * t_k, 128)
    out_ref[...] += jnp.dot(
        adj_ref[...], sup_ref[pl.ds(k_off, t_k), :],
        preferred_element_type=jnp.float32)

    @pl.when(k == pl.num_programs(1) - 1)
    def _finalize():
        if active:  # static Python bool (kernel specialized via partial)
            out_ref[...] = jnp.maximum(out_ref[...], 0.0)


def _adj_matmul_stream_kernel(adj_ref, sup_ref, out_ref, *, active):
    # adj_ref: [t_n, t_k]  sup_ref: [t_k, F_out_p]  out_ref: [t_n, F_out_p] f32
    k = pl.program_id(1)

    @pl.when(k == 0)
    def _init():
        out_ref[...] = jnp.zeros_like(out_ref)

    out_ref[...] += jnp.dot(
        adj_ref[...], sup_ref[...], preferred_element_type=jnp.float32)

    @pl.when(k == pl.num_programs(1) - 1)
    def _finalize():
        if active:
            out_ref[...] = jnp.maximum(out_ref[...], 0.0)


def gnn_layer(features, adj, weight, *, active=True,
              tile_n=512, tile_k=1024, use_bf16=False):
    """GCN layer forward: [relu](adj @ (features @ weight))."""
    n, f_in = features.shape
    assert adj.shape == (n, n)
    assert weight.shape[0] == f_in
    f_out = weight.shape[1]

    compute_dtype = jnp.bfloat16 if use_bf16 else jnp.float32
    itemsize = jnp.dtype(compute_dtype).itemsize

    # ---- tile / padding selection (everything 128-aligned, lane-dense) ------
    f_out_p = _round_up(f_out, 128)
    n128 = _round_up(n, 128)
    t_n = max(128, min(_round_up(tile_n, 128), n128))
    t_k = max(128, min(_round_up(tile_k, 128), n128))
    # Keep >= 2 row tiles when possible so the 'parallel' row axis can shard
    # across v7x's two TensorCores.
    while t_n > 128 and pl.cdiv(n, t_n) < 2:
        t_n = max(128, (t_n // 2) // 128 * 128)
    n_p = _round_up(n, math.lcm(t_n, t_k))

    # ---- VMEM budget (per generation) & support-residency decision ----------
    vmem_budget = int(_vmem_capacity_bytes() * 0.85)
    headroom = 4 << 20
    adj_bytes = 2 * t_n * t_k * itemsize           # adj tile, double-buffered
    out_bytes = 2 * t_n * f_out_p * 4              # f32 out tile (accumulator)
    sup_full_bytes = 2 * n_p * f_out_p * itemsize  # whole support (2x: safe)
    support_resident = (adj_bytes + out_bytes + sup_full_bytes
                        + headroom) <= vmem_budget
    sup_bytes = sup_full_bytes if support_resident else 2 * t_k * f_out_p * itemsize
    needed_vmem = adj_bytes + out_bytes + sup_bytes + headroom
    vmem_limit = int(min(max(needed_vmem, 32 << 20), vmem_budget))

    # ---- pad / cast only when actually needed --------------------------------
    def _prep(x, row_pad, col_pad):
        if row_pad or col_pad:
            x = jnp.pad(x, ((0, row_pad), (0, col_pad)))
        return x if x.dtype == compute_dtype else x.astype(compute_dtype)

    # TODO(synk): adj is reused across GNN layers in a full model; cache the
    # padded/cast adjacency across layer invocations instead of re-preparing it.
    feat_p = _prep(features, n_p - n, 0)
    adj_p = _prep(adj, n_p - n, n_p - n)
    w_p = _prep(weight, 0, f_out_p - f_out)

    # ---- stage 1: support = features @ W (once; no per-row-tile recompute) ---
    support = pl.pallas_call(
        _feature_transform_kernel,
        out_shape=jax.ShapeDtypeStruct((n_p, f_out_p), compute_dtype),
        grid_spec=pltpu.PrefetchScalarGridSpec(
            num_scalar_prefetch=0,
            grid=(n_p // t_n,),
            in_specs=[
                pl.BlockSpec((t_n, f_in), lambda i: (i, 0)),      # feature rows
                pl.BlockSpec((f_in, f_out_p), lambda i: (0, 0)),  # weight (small)
            ],
            out_specs=pl.BlockSpec((t_n, f_out_p), lambda i: (i, 0)),
        ),
        compiler_params=pltpu.CompilerParams(
            dimension_semantics=("parallel",)),
        cost_estimate=pl.CostEstimate(
            flops=2 * n_p * f_in * f_out_p,
            transcendentals=0,
            bytes_accessed=(n_p * f_in + f_in * f_out_p
                            + n_p * f_out_p) * itemsize),
    )(feat_p, w_p)

    # ---- stage 2: out = [relu](adj @ support), K-tiled reduction -------------
    if support_resident:
        kernel = functools.partial(
            _adj_matmul_resident_kernel, active=active, t_k=t_k)
        # Constant block index => support is DMA'd into VMEM once per core.
        sup_spec = pl.BlockSpec((n_p, f_out_p), lambda i, k: (0, 0))
        sup_traffic = n_p * f_out_p * itemsize
    else:
        kernel = functools.partial(_adj_matmul_stream_kernel, active=active)
        sup_spec = pl.BlockSpec((t_k, f_out_p), lambda i, k: (k, 0))
        sup_traffic = (n_p // t_n) * n_p * f_out_p * itemsize

    # TODO(synk): int8 (v6e) / fp8-e4m3 (v7x) quantized adjacency streaming
    # with per-row scales would further shrink the dominant adj HBM stream.
    out_p = pl.pallas_call(
        kernel,
        out_shape=jax.ShapeDtypeStruct((n_p, f_out_p), jnp.float32),
        grid_spec=pltpu.PrefetchScalarGridSpec(
            num_scalar_prefetch=0,
            grid=(n_p // t_n, n_p // t_k),           # reduction axis last
            in_specs=[
                pl.BlockSpec((t_n, t_k), lambda i, k: (i, k)),   # adj tile
                sup_spec,                                        # support
            ],
            out_specs=pl.BlockSpec((t_n, f_out_p), lambda i, k: (i, 0)),
        ),
        compiler_params=pltpu.CompilerParams(
            dimension_semantics=("parallel", "arbitrary"),
            vmem_limit_bytes=vmem_limit),
        cost_estimate=pl.CostEstimate(
            flops=2 * n_p * n_p * f_out_p,
            transcendentals=0,
            bytes_accessed=(n_p * n_p * itemsize       # adj stream (dominant)
                            + sup_traffic              # support
                            + n_p * f_out_p * 4)),     # output
    )(adj_p, support)

    # TODO(synk): torch.spmm's sparse adjacency has no Pallas sparse path here;
    # adj is handled densely (numerically identical).
    return out_p[:n, :f_out]


def xavier_uniform(key, in_features, out_features):
    # torch.nn.init.xavier_uniform_ : U(-a, a), a = sqrt(6 / (fan_in + fan_out))
    bound = (6.0 / (in_features + out_features)) ** 0.5
    return jax.random.uniform(key, (in_features, out_features),
                              dtype=jnp.float32, minval=-bound, maxval=bound)


def _make_inputs(key, n, f_in, f_out):
    k_feat, k_adj, k_w = jax.random.split(key, 3)
    features = jax.random.normal(k_feat, (n, f_in), dtype=jnp.float32)
    # Simple symmetric, row-normalized adjacency (dense stand-in for spmm).
    raw = jax.random.uniform(k_adj, (n, n), dtype=jnp.float32)
    adj = (raw > 0.8).astype(jnp.float32)
    adj = jnp.maximum(adj, adj.T) + jnp.eye(n, dtype=jnp.float32)
    adj = adj / jnp.sum(adj, axis=1, keepdims=True)
    weight = xavier_uniform(k_w, f_in, f_out)
    return features, adj, weight


if __name__ == "__main__":
    key = jax.random.PRNGKey(0)
    k1, k2 = jax.random.split(key)

    # Case 1: small aligned graph (single tile per stage, no padding copies).
    N, F_IN, F_OUT = 128, 32, 64
    features, adj, weight = _make_inputs(k1, N, F_IN, F_OUT)
    ref = adj @ (features @ weight)
    ref_relu = jnp.maximum(ref, 0.0)

    out = jax.block_until_ready(gnn_layer(features, adj, weight, active=True))
    assert out.shape == (N, F_OUT)
    assert jnp.allclose(out, ref_relu, atol=1e-4, rtol=1e-4)

    out_noact = jax.block_until_ready(
        gnn_layer(features, adj, weight, active=False))
    assert jnp.allclose(out_noact, ref, atol=1e-4, rtol=1e-4)

    # bf16 MXU-input path (f32 accumulation); valid on v5e/v6e/v7x.
    out_bf16 = jax.block_until_ready(
        gnn_layer(features, adj, weight, active=True, use_bf16=True))
    assert jnp.allclose(out_bf16, ref_relu, atol=5e-2, rtol=5e-2)

    # Case 2: unaligned graph -> exercises padding, multiple row tiles,
    # resident-support slicing across a multi-tile grid.
    N2, F_IN2, F_OUT2 = 300, 48, 80
    features2, adj2, weight2 = _make_inputs(k2, N2, F_IN2, F_OUT2)
    ref2 = jnp.maximum(adj2 @ (features2 @ weight2), 0.0)
    out2 = jax.block_until_ready(gnn_layer(features2, adj2, weight2, active=True))
    assert out2.shape == (N2, F_OUT2)
    assert jnp.allclose(out2, ref2, atol=1e-4, rtol=1e-4)

    print("KERNEL_OK")
</pallas_src>

<mosaic_0001>
module attributes {stable_mosaic.version = 11 : i64} {
  func.func @_feature_transform_kernel(%arg0: i32, %arg1: memref<128x32xf32, #tpu.memory_space<vmem>>, %arg2: memref<32x128xf32, #tpu.memory_space<vmem>>, %arg3: memref<128x128xf32, #tpu.memory_space<vmem>>) attributes {dimension_semantics = [#tpu.dimension_semantics<parallel>], iteration_bounds = array<i64: 1>, scalar_prefetch = 0 : i64, scratch_operands = 0 : i64, tpu.core_type = #tpu.core_type<tc>, window_params = [{transform_indices = @transform_0, window_bounds = array<i64: 128, 32>}, {pipeline_mode = #tpu.pipeline_mode<synchronous>, transform_indices = @transform_1, window_bounds = array<i64: 32, 128>}, {transform_indices = @transform_2, window_bounds = array<i64: 128, 128>}]} {
    %c0 = arith.constant 0 : index
    %c0_0 = arith.constant 0 : index
    %0 = vector.load %arg1[%c0, %c0_0] : memref<128x32xf32, #tpu.memory_space<vmem>>, vector<128x32xf32>
    %c0_1 = arith.constant 0 : index
    %c0_2 = arith.constant 0 : index
    %1 = vector.load %arg2[%c0_1, %c0_2] : memref<32x128xf32, #tpu.memory_space<vmem>>, vector<32x128xf32>
    %cst = arith.constant dense<0.000000e+00> : vector<128x128xf32>
    %2 = tpu.matmul %0, %1, %cst {dimension_numbers = #tpu.dot_dimension_numbers<[1], [0], [0], [1], [0, 0, 1, 1], [], []>} : vector<128x32xf32>, vector<32x128xf32>, vector<128x128xf32> -> vector<128x128xf32>
    %c0_3 = arith.constant 0 : index
    %c0_4 = arith.constant 0 : index
    %3 = vector.load %arg3[%c0_3, %c0_4] : memref<128x128xf32, #tpu.memory_space<vmem>>, vector<128x128xf32>
    tpu.vector_store %arg3[%c0_3, %c0_4], %2 {strides = array<i32>} : memref<128x128xf32, #tpu.memory_space<vmem>>, vector<128x128xf32>,
    return
  }
  func.func @transform_0(%arg0: i32) -> (i32, i32) {
    %c0_i32 = arith.constant 0 : i32
    %c0_i32_0 = arith.constant 0 : i32
    return %arg0, %c0_i32 : i32, i32
  }
  func.func @transform_1(%arg0: i32) -> (i32, i32) {
    %c0_i32 = arith.constant 0 : i32
    %c0_i32_0 = arith.constant 0 : i32
    %c0_i32_1 = arith.constant 0 : i32
    return %c0_i32, %c0_i32_0 : i32, i32
  }
  func.func @transform_2(%arg0: i32) -> (i32, i32) {
    %c0_i32 = arith.constant 0 : i32
    %c0_i32_0 = arith.constant 0 : i32
    return %arg0, %c0_i32 : i32, i32
  }
}

</mosaic_0001>

<bundles_post_ra>
// kernel: tpu_custom_call.1
= control target key start
LH: loop header
LB: loop body
LE: loop exit
PB: predicated region body
PF: predicated region fallthrough
CT: control target
= control target key end

     0   :  { %vm32_vm0 = vcmask 261120   ;;  %s471_s0 = inlined_call_operand.vmem [shape: f32[128,32], index: 0, kind: input, shape index: {}]   ;;  %s472_s1 = inlined_call_operand.vmem [shape: f32[32,128], index: 1, kind: input, shape index: {}]   ;;  %s473_s2 = inlined_call_operand.hbm [shape: f32[128,128], index: 2, kind: output, shape index: {}]  }
   0x1   :  { %v28_v0 = vld [vmem:[%s472_s1] sm:$0xff]  ;;  %v29_v1 = vld [vmem:[%s472_s1 + $0x8] sm:$0xff]  ;;  %v30_v2 = vld [vmem:[%s472_s1 + $0x10] sm:$0xff] }
   0x2   :  { %v326_v3 = vpack.c.bf16 %v29_v1, %v28_v0  ;;  %v31_v4 = vld [vmem:[%s472_s1 + $0x18] sm:$0xff]  ;;  %v12_v5 = vld [vmem:[%s471_s0] sm:$0xff] }
   0x3   :  { %v20_v6 = vld [vmem:[%s471_s0 + $0x40] sm:$0xff]  ;;  %v330_v7 = vpack.c.bf16 %v31_v4, %v30_v2  ;;  %302 = vmatprep.mubr.msk.f32.mxu0 %vm32_vm0, %v12_v5 }
   0x4   :  { %314 = vmatprep.mubr.msk.f32.mxu1 %vm32_vm0, %v20_v6  ;;  %327 = vmatprep.subr.bf16.mxu0 %v326_v3 }
   0x5   :  { %334 = vmatprep.subr.bf16.mxu1 %v326_v3  ;;  %329 = vmatpush3.bf16.msra.mxu0 %v326_v3 }
   0x6   :  { %336 = vmatpush3.bf16.msra.mxu1 %v326_v3  ;;  %331 = vmatprep.subr.bf16.mxu0 %v330_v7 }
   0x7   :  { %335 = vmatprep.subr.bf16.mxu1 %v330_v7 }
   0x8   :  { %7 = vsyncpa [#allocation3], 0  ;;  %v13_v8 = vld [vmem:[%s471_s0 + $0x8] sm:$0xff]  ;;  %v14_v10 = vld [vmem:[%s471_s0 + $0x10] sm:$0xff] }
   0x9   :  { %333 = vmatpush3.bf16.msra.mxu0 %v330_v7  ;;  %v21_v9 = vld [vmem:[%s471_s0 + $0x48] sm:$0xff]  ;;  %v22_v11 = vld [vmem:[%s471_s0 + $0x50] sm:$0xff]  ;;  %v15_v12 = vld [vmem:[%s471_s0 + $0x18] sm:$0xff] }
   0xa   :  { %337 = vmatpush3.bf16.msra.mxu1 %v330_v7  ;;  %v23_v13 = vld [vmem:[%s471_s0 + $0x58] sm:$0xff]  ;;  %v16_v14 = vld [vmem:[%s471_s0 + $0x20] sm:$0xff]  ;;  %v17_v16 = vld [vmem:[%s471_s0 + $0x28] sm:$0xff] }
   0xb   :  { %v24_v15 = vld [vmem:[%s471_s0 + $0x60] sm:$0xff]  ;;  %v25_v17 = vld [vmem:[%s471_s0 + $0x68] sm:$0xff]  ;;  %v18_v18 = vld [vmem:[%s471_s0 + $0x30] sm:$0xff] }
   0xc   :  { %303 = vmatmul.mubr.msk.f32.vlgmr.msra.gmra.mrb[0].mxu0 %vm32_vm0, %v13_v8  ;;  %v26_v19 = vld [vmem:[%s471_s0 + $0x70] sm:$0xff]  ;;  %v19_v20 = vld [vmem:[%s471_s0 + $0x38] sm:$0xff] }
   0xd   :  { %315 = vmatmul.mubr.msk.f32.vlgmr.msra.gmra.mrb[0].mxu1 %vm32_vm0, %v21_v9  ;;  %305 = vmatprep.mubr.msk.f32.mxu0 %vm32_vm0, %v14_v10  ;;  %v27_v21 = vld [vmem:[%s471_s0 + $0x78] sm:$0xff]  ;;  %s365_s0 = smov [#allocation2]  }
   0xe   :  { %317 = vmatprep.mubr.msk.f32.mxu1 %vm32_vm0, %v22_v11  ;;  %s247_s20 = sshll.u32 %s365_s0, 4  ;;  %s248_s20 = int_to_ptr.vmem [resolvable:$true] %s247_s20 }
   0xf   :  { %s341_s1 = scalar_lea.vmem %s248_s20, 2048  ;;  %p346_p1 = scmp.lt.s32.totalorder %s248_s20, %s248_s20 }
  0x10   :  { %306 = vmatmul.mubr.msk.f32.gmra.mrb[2].mxu0 %vm32_vm0, %v15_v12  ;;  %p342_p0 = scmp.ne.s32.totalorder %s248_s20, %s341_s1  ;;  %p347_p2 = scmp.lt.s32.totalorder %s341_s1, %s341_s1 }
  0x11   :  { %318 = vmatmul.mubr.msk.f32.gmra.mrb[2].mxu1 %vm32_vm0, %v23_v13  ;;  %308 = vmatprep.mubr.msk.f32.mxu0 %vm32_vm0, %v16_v14 }
  0x12   :  { %320 = vmatprep.mubr.msk.f32.mxu1 %vm32_vm0, %v24_v15  ;;  %p348_p3 = por %p347_p2, %p346_p1 }
  0x14   :  { %309 = vmatmul.mubr.msk.f32.gmra.mrb[4].mxu0 %vm32_vm0, %v17_v16  ;;  %p349_p4 = pnand %p348_p3, %p342_p0 }
  0x15   :  { %321 = vmatmul.mubr.msk.f32.gmra.mrb[4].mxu1 %vm32_vm0, %v25_v17  ;;  %311 = vmatprep.mubr.msk.f32.mxu0 %vm32_vm0, %v18_v18 }
  0x16   :  { %323 = vmatprep.mubr.msk.f32.mxu1 %vm32_vm0, %v26_v19 }
  0x18   :  { %312 = vmatmul.mubr.msk.f32.gmra.mrb[6].mxu0 %vm32_vm0, %v19_v20 }
  0x19   :  { %324 = vmatmul.mubr.msk.f32.gmra.mrb[6].mxu1 %vm32_vm0, %v27_v21 }
  0xdf   :  { %v304_v22 = vpop.f32.mrb[0].mxu0 }
  0xe0   :  { %v316_v23 = vpop.f32.mrb[0].mxu1  ;;  %227 = vst [vmem:[#allocation2 + $0x8] sm:$0xff] %v304_v22  ;;  %v147_v24 = vpop.f32.mrb[1].mxu0 }
  0xe1   :  { %235 = vst [vmem:[#allocation2 + $0x48] sm:$0xff] %v316_v23  ;;  %v187_v25 = vpop.f32.mrb[1].mxu1  ;;  %226 = vst [vmem:[#allocation2] sm:$0xff] %v147_v24 }
  0xe2   :  { %234 = vst [vmem:[#allocation2 + $0x40] sm:$0xff] %v187_v25 }
  0xe3   :  { %v307_v26 = vpop.f32.mrb[2].mxu0 }
  0xe4   :  { %v319_v27 = vpop.f32.mrb[2].mxu1  ;;  %229 = vst [vmem:[#allocation2 + $0x18] sm:$0xff] %v307_v26  ;;  %v157_v28 = vpop.f32.mrb[3].mxu0 }
  0xe5   :  { %237 = vst [vmem:[#allocation2 + $0x58] sm:$0xff] %v319_v27  ;;  %v197_v29 = vpop.f32.mrb[3].mxu1  ;;  %228 = vst [vmem:[#allocation2 + $0x10] sm:$0xff] %v157_v28 }
  0xe6   :  { %236 = vst [vmem:[#allocation2 + $0x50] sm:$0xff] %v197_v29 }
  0xe7   :  { %v310_v30 = vpop.f32.mrb[4].mxu0 }
  0xe8   :  { %v322_v31 = vpop.f32.mrb[4].mxu1  ;;  %231 = vst [vmem:[#allocation2 + $0x28] sm:$0xff] %v310_v30  ;;  %v167_v32 = vpop.f32.mrb[5].mxu0 }
  0xe9   :  { %239 = vst [vmem:[#allocation2 + $0x68] sm:$0xff] %v322_v31  ;;  %v207_v33 = vpop.f32.mrb[5].mxu1  ;;  %230 = vst [vmem:[#allocation2 + $0x20] sm:$0xff] %v167_v32 }
  0xea   :  { %238 = vst [vmem:[#allocation2 + $0x60] sm:$0xff] %v207_v33 }
  0xeb   :  { %v313_v34 = vpop.f32.mrb[6].mxu0 }
  0xec   :  { %v325_v35 = vpop.f32.mrb[6].mxu1  ;;  %233 = vst [vmem:[#allocation2 + $0x38] sm:$0xff] %v313_v34  ;;  %v177_v36 = vpop.f32.mrb[7].mxu0 }
  0xed   :  { %241 = vst [vmem:[#allocation2 + $0x78] sm:$0xff] %v325_v35  ;;  %v217_v37 = vpop.f32.mrb[7].mxu1  ;;  %232 = vst [vmem:[#allocation2 + $0x30] sm:$0xff] %v177_v36 }
  0xee   :  { %240 = vst [vmem:[#allocation2 + $0x70] sm:$0xff] %v217_v37 }
  0xef   :  { %352 = shalt.err (!%p349_p4)
}
  0xf0   :  { %s353_s23 = scalar_lea.hbm %s473_s2, 2048 }
  0xf1   :  { %p354_p5 = scmp.ne.s32.totalorder %s473_s2, %s353_s23  ;;  %p357_p6 = scmp.lt.u32.totalorder %s353_s23, %s473_s2 }
  0xf3   :  { %p359_p7 = pnand %p357_p6, %p354_p5 }
  0xf5   :  { %362 = shalt.err (!%p359_p7)
}
  0xf6   :  { %s366_s28 = smov 128   ;;  %s367_s29 = smov 8  }
  0xf7   :  { %253 = dma.vmem_to_hbm [thread:$0]  %s248_s20, 2048, %s473_s2, [#allocation3], %s366_s28, %s366_s28, %s367_s29  }
  0xf8   :  { %363 = dma.done.wait [#allocation3], 2048  }
  0xf9   :  { %364 = vsyncadd [#allocation3], 4294965248 }
  0xfa   :  { %257 = vsyncpa [#allocation3], 1 }

</bundles_post_ra>
